<compile_context>
chip_gen: v5e
topology: v5e:2x2
jax: 0.10.0
libtpu: 0.0.40
codegen_flags: <defaults>
</compile_context>

<pallas_src>
from functools import partial

import jax
import jax.numpy as jnp
from jax import lax
from jax.experimental import pallas as pl
from jax.experimental.pallas import tpu as pltpu

_HALF_PI = 1.5707963267948966
_LANES = 128          # samples per lane row
_CHUNK_ROWS = 8       # sublane rows per inner chunk -> full (8,128) f32 vregs
_TILE_ROWS = 256      # rows of 128 samples per grid step (1 MiB block)


def _pick_unroll(n_chunks):
    for u in (4, 3, 2, 1):
        if n_chunks % u == 0:
            return u
    return 1


def _atan_01(t):
    # arctan(t) for t in [0, 1]; degree-11 odd minimax (|err| ~ 1.5e-6).
    # mul/add only (guaranteed lowering, stays on the VALU/FMA path).
    t2 = t * t
    p = jnp.float32(-0.0117212)
    p = p * t2 + jnp.float32(0.05265332)
    p = p * t2 + jnp.float32(-0.11643287)
    p = p * t2 + jnp.float32(0.19354346)
    p = p * t2 + jnp.float32(-0.33262347)
    p = p * t2 + jnp.float32(0.99997726)
    return p * t


def _fast_recip(x):
    # EUP approximate reciprocal + one Newton step (~1e-7 rel err): keeps the
    # division off the VALU while leaving >100x margin under the 5e-3 budget.
    r = pl.reciprocal(x, approx=True)
    return r * (2.0 - x * r)


def _atan2_nonneg(y, x):
    # atan2(y, x) for y >= 0, x >= 0  ->  result in [0, pi/2]
    swap = y > x
    num = jnp.where(swap, x, y)
    den = jnp.where(swap, y, x)
    t = num * _fast_recip(jnp.maximum(den, jnp.float32(1e-30)))
    a = _atan_01(t)
    return jnp.where(swap, jnp.float32(_HALF_PI) - a, a)


def _huber(v):
    # HuberLoss, delta = 1.0, branchless:  m = min(|v|, 1);  m*(|v| - 0.5*m)
    av = jnp.abs(v)
    m = jnp.minimum(av, jnp.float32(1.0))
    return m * (av - 0.5 * m)


def quaternion_loss_kernel(q_ref, sum_ref, cnt_ref):
    """q_ref: (8, tile_rows, 128) packed quats; outputs: (8,128) partial sums/counts."""
    tile_rows = q_ref.shape[1]
    n_chunks = tile_rows // _CHUNK_ROWS

    def chunk_body(c, carry):
        s_acc, c_acc = carry
        r0 = pl.multiple_of(c * _CHUNK_ROWS, _CHUNK_ROWS)
        qc = q_ref[:, pl.ds(r0, _CHUNK_ROWS), :]          # (8, CH, 128)
        tx, ty, tz, tw = qc[0], qc[1], qc[2], qc[3]       # true  xyzw
        px, py, pz, pw = qc[4], qc[5], qc[6], qc[7]       # pred  xyzw

        # Validity: torch loop does `continue` when the TRUE quat has any NaN.
        # NaN in any component <=> NaN sum of squares (infs square to +inf).
        t_nn = tx * tx + ty * ty + tz * tz + tw * tw
        valid = jnp.logical_not(jnp.isnan(t_nn))

        # rotation_diff = pred (x) conj(true), computed on the UNNORMALIZED
        # inputs: |p x conj(t)| = |p||t|, and both the angle (atan2 of two
        # same-scaled quantities) and the axis are scale invariant, so the
        # per-input normalizations of v2 are folded away.  (A zero-norm but
        # NaN-free quaternion — where scipy would raise — yields loss 0 here.)
        dx = tw * px - pw * tx + pz * ty - py * tz
        dy = tw * py - pw * ty + px * tz - pz * tx
        dz = tw * pz - pw * tz + py * tx - px * ty
        dw = pw * tw + px * tx + py * ty + pz * tz

        # canonicalize so w >= 0  ->  0 <= angle <= pi  (scipy as_rotvec)
        sgn = jnp.where(dw < 0.0, jnp.float32(-1.0), jnp.float32(1.0))
        dx, dy, dz, dw = dx * sgn, dy * sgn, dz * sgn, dw * sgn

        ss = dx * dx + dy * dy + dz * dz                  # |vec|^2 (scaled)
        norm2 = ss + dw * dw                              # = |pred|^2 |true|^2
        inv_s = lax.rsqrt(jnp.maximum(ss, jnp.float32(1e-30)))
        s = ss * inv_s                                    # == sqrt(ss)
        angle = 2.0 * _atan2_nonneg(s, dw)                # scale invariant

        # scipy as_rotvec: small-angle Taylor vs angle/sin(angle/2).
        # large branch: rotvec = angle * (dx,dy,dz)/s          (scale free)
        # small branch: rotvec = (dx,dy,dz)/|d| * (2 + ...)    (needs 1 rsqrt)
        angle2 = angle * angle
        small = lax.rsqrt(jnp.maximum(norm2, jnp.float32(1e-30))) * (
            2.0 + angle2 * (1.0 / 12.0) + (angle2 * angle2) * (7.0 / 2880.0))
        large = angle * inv_s
        scale = jnp.where(angle <= 1e-3, small, large)

        # HuberLoss(delta=1.0, reduction='mean') over the 3 rotvec components
        per_sample = (_huber(scale * dx) + _huber(scale * dy)
                      + _huber(scale * dz)) * (1.0 / 3.0)
        masked = jnp.where(valid, per_sample, jnp.float32(0.0))
        return s_acc + masked, c_acc + valid.astype(jnp.float32)

    zero = jnp.zeros((_CHUNK_ROWS, _LANES), jnp.float32)
    s_acc, c_acc = lax.fori_loop(0, n_chunks, chunk_body, (zero, zero),
                                 unroll=_pick_unroll(n_chunks))
    sum_ref[...] = s_acc
    cnt_ref[...] = c_acc


def _pack_quaternions(tq, pq, rows_pad):
    """-> (8, rows_pad, 128) f32, component-major.

    Rows 0-3 true xyzw (padding = NaN so padded samples are masked out),
    rows 4-7 pred xyzw (padding = identity quat, avoids inf/NaN noise).
    One concat + one transpose + one reshape: fuses to a single producer
    under jit.
    """
    b = tq.shape[0]
    n_pad = rows_pad * _LANES
    qcat = jnp.concatenate([tq, pq], axis=1)                     # (b, 8)
    if n_pad > b:
        pad_row = jnp.array([jnp.nan, jnp.nan, jnp.nan, jnp.nan,
                             0.0, 0.0, 0.0, 1.0], jnp.float32)
        qcat = jnp.concatenate(
            [qcat, jnp.broadcast_to(pad_row, (n_pad - b, 8))], axis=0)
    return qcat.T.reshape(8, rows_pad, _LANES)


def reference_loss(qt, qp):
    """Pure-JAX reference (same math, exact arctan2/divides). Also the tiny-batch path."""
    valid = ~jnp.any(jnp.isnan(qt), axis=1)
    qt_n = qt / jnp.linalg.norm(qt, axis=1, keepdims=True)
    qp_n = qp / jnp.linalg.norm(qp, axis=1, keepdims=True)
    tx, ty, tz, tw = (qt_n[:, i] for i in range(4))
    px, py, pz, pw = (qp_n[:, i] for i in range(4))
    qx, qy, qz, qw = -tx, -ty, -tz, tw
    dx = pw * qx + qw * px + (py * qz - pz * qy)
    dy = pw * qy + qw * py + (pz * qx - px * qz)
    dz = pw * qz + qw * pz + (px * qy - py * qx)
    dw = pw * qw - (px * qx + py * qy + pz * qz)
    sgn = jnp.where(dw < 0.0, -1.0, 1.0)
    dx, dy, dz, dw = dx * sgn, dy * sgn, dz * sgn, dw * sgn
    s = jnp.sqrt(dx * dx + dy * dy + dz * dz)
    angle = 2.0 * jnp.arctan2(s, dw)
    scale = jnp.where(angle <= 1e-3,
                      2.0 + angle ** 2 / 12.0 + 7.0 * angle ** 4 / 2880.0,
                      angle / jnp.maximum(s, 1e-30))
    r = jnp.stack([scale * dx, scale * dy, scale * dz], axis=1)
    h = jnp.where(jnp.abs(r) <= 1.0, 0.5 * r * r, jnp.abs(r) - 0.5)
    per_sample = h.mean(axis=1)
    masked = jnp.where(valid, per_sample, 0.0)
    count = valid.sum().astype(jnp.float32)
    return jnp.where(count > 0.0, masked.sum() / jnp.maximum(count, 1.0), 0.0)


_reference_loss_jit = jax.jit(reference_loss)


@partial(jax.jit, static_argnames=("tile_rows",))
def _quaternion_loss_pallas(tq, pq, tile_rows):
    b = tq.shape[0]
    rows = -(-b // _LANES)                       # rows of 128 samples (static)
    tile_rows = max(_CHUNK_ROWS, (tile_rows // _CHUNK_ROWS) * _CHUNK_ROWS)

    if rows <= _CHUNK_ROWS:
        tr = _CHUNK_ROWS
    else:
        # Cap the tile so there are >= 2 grid steps: keeps the "parallel" grid
        # axis shardable across both TensorCores on v7x while still amortizing
        # per-step pipeline overhead with the large default tile.
        half = -(-rows // 2)
        half = ((half + _CHUNK_ROWS - 1) // _CHUNK_ROWS) * _CHUNK_ROWS
        tr = min(tile_rows, half)
    rows_pad = ((rows + tr - 1) // tr) * tr
    num_tiles = rows_pad // tr

    packed = _pack_quaternions(tq, pq, rows_pad)          # (8, rows_pad, 128)

    sums, cnts = pl.pallas_call(
        quaternion_loss_kernel,
        out_shape=(
            jax.ShapeDtypeStruct((num_tiles, _CHUNK_ROWS, _LANES), jnp.float32),
            jax.ShapeDtypeStruct((num_tiles, _CHUNK_ROWS, _LANES), jnp.float32),
        ),
        grid=(num_tiles,),
        in_specs=[pl.BlockSpec((8, tr, _LANES), lambda i: (0, i, 0))],
        out_specs=(
            pl.BlockSpec((None, _CHUNK_ROWS, _LANES), lambda i: (i, 0, 0)),
            pl.BlockSpec((None, _CHUNK_ROWS, _LANES), lambda i: (i, 0, 0)),
        ),
        compiler_params=pltpu.CompilerParams(
            # Grid steps are independent per-tile partials -> megacore sharding.
            dimension_semantics=("parallel",),
            # 1 MiB block, 2 MiB double-buffered: far under every chip's VMEM.
            vmem_limit_bytes=32 * 1024 * 1024,
        ),
    )(packed)

    total = jnp.sum(sums)
    count = jnp.sum(cnts)
    return jnp.where(count > 0.0, total / jnp.maximum(count, 1.0),
                     jnp.float32(0.0))


def quaternion_loss(true_quaternions, predicted_quaternions, batch_X=None, *,
                    force_pallas=False, tile_rows=_TILE_ROWS,
                    pallas_min_batch=1024):
    """Host wrapper. `batch_X` is unused (torch only used it for device placement)."""
    tq = jnp.asarray(true_quaternions, jnp.float32)
    pq = jnp.asarray(predicted_quaternions, jnp.float32)
    if not force_pallas and tq.shape[0] < pallas_min_batch:
        # Tiny batches: launch + DMA latency dominates — fused XLA path wins.
        return _reference_loss_jit(tq, pq)
    return _quaternion_loss_pallas(tq, pq, tile_rows=int(tile_rows))


if __name__ == "__main__":
    key = jax.random.PRNGKey(0)

    # --- Check 1: small batch, NaN rows (skipped), lane padding, single grid tile.
    B1 = 300
    k1, k2, k3, k4 = jax.random.split(key, 4)
    true_q1 = jax.random.normal(k1, (B1, 4), dtype=jnp.float32)
    pred_q1 = jax.random.normal(k2, (B1, 4), dtype=jnp.float32)
    true_q1 = true_q1.at[3].set(jnp.nan)        # whole quaternion NaN -> skipped
    true_q1 = true_q1.at[17, 2].set(jnp.nan)    # single NaN component -> skipped
    batch_X1 = jnp.zeros((B1, 16), dtype=jnp.float32)  # unused, signature parity

    loss1 = quaternion_loss(true_q1, pred_q1, batch_X1, force_pallas=True)
    loss1 = jax.block_until_ready(loss1)
    ref1 = reference_loss(true_q1, pred_q1)
    assert jnp.allclose(loss1, ref1, atol=5e-3, rtol=5e-3), (float(loss1), float(ref1))

    # --- Check 2: multi-tile grid (exercises parallel batch tiling + wrapper reduce).
    B2 = 2048
    true_q2 = jax.random.normal(k3, (B2, 4), dtype=jnp.float32)
    pred_q2 = jax.random.normal(k4, (B2, 4), dtype=jnp.float32)
    true_q2 = true_q2.at[100].set(jnp.nan)

    loss2 = quaternion_loss(true_q2, pred_q2, force_pallas=True, tile_rows=8)
    loss2 = jax.block_until_ready(loss2)
    ref2 = reference_loss(true_q2, pred_q2)
    assert jnp.allclose(loss2, ref2, atol=5e-3, rtol=5e-3), (float(loss2), float(ref2))

    # --- Check 3: default (large) tile, two grid steps, partially-unrolled chunk loop.
    k5, k6 = jax.random.split(k4)
    B3 = 5000
    true_q3 = jax.random.normal(k5, (B3, 4), dtype=jnp.float32)
    pred_q3 = jax.random.normal(k6, (B3, 4), dtype=jnp.float32)
    loss3 = quaternion_loss(true_q3, pred_q3, force_pallas=True)
    loss3 = jax.block_until_ready(loss3)
    ref3 = reference_loss(true_q3, pred_q3)
    assert jnp.allclose(loss3, ref3, atol=5e-3, rtol=5e-3), (float(loss3), float(ref3))

    # TODO(synk): autograd through the scipy round-trip / requires_grad bits is not
    # meaningful here; this kernel implements the forward value only.
    print("KERNEL_OK")
</pallas_src>

<mosaic_0001>
module attributes {stable_mosaic.version = 11 : i64} {
  func.func @quaternion_loss_kernel(%arg0: i32, %arg1: memref<8x8x128xf32, #tpu.memory_space<vmem>>, %arg2: memref<1x8x128xf32, #tpu.memory_space<vmem>>, %arg3: memref<1x8x128xf32, #tpu.memory_space<vmem>>) attributes {dimension_semantics = [#tpu.dimension_semantics<parallel>], iteration_bounds = array<i64: 1>, scalar_prefetch = 0 : i64, scratch_operands = 0 : i64, tpu.core_type = #tpu.core_type<tc>, window_params = [{transform_indices = @transform_0, window_bounds = array<i64: 8, 8, 128>}, {transform_indices = @transform_1, window_bounds = array<i64: 1, 8, 128>}, {transform_indices = @transform_2, window_bounds = array<i64: 1, 8, 128>}]} {
    %cst = arith.constant 0.000000e+00 : f32
    %0 = vector.broadcast %cst : f32 to vector<8x128xf32>
    %c0_i32 = arith.constant 0 : i32
    %c8_i32 = arith.constant 8 : i32
    %1 = arith.muli %c0_i32, %c8_i32 : i32
    %2 = tpu.assume_multiple %1, 8 : i32
    %c0 = arith.constant 0 : index
    %3 = arith.index_cast %2 : i32 to index
    %c0_0 = arith.constant 0 : index
    %4 = vector.load %arg1[%c0, %3, %c0_0] : memref<8x8x128xf32, #tpu.memory_space<vmem>>, vector<8x8x128xf32>
    %5 = vector.extract_strided_slice %4 {offsets = [0, 0, 0], sizes = [1, 8, 128], strides = [1, 1, 1]} : vector<8x8x128xf32> to vector<1x8x128xf32>
    %6 = vector.shape_cast %5 : vector<1x8x128xf32> to vector<8x128xf32>
    %7 = vector.extract_strided_slice %4 {offsets = [1, 0, 0], sizes = [1, 8, 128], strides = [1, 1, 1]} : vector<8x8x128xf32> to vector<1x8x128xf32>
    %8 = vector.shape_cast %7 : vector<1x8x128xf32> to vector<8x128xf32>
    %9 = vector.extract_strided_slice %4 {offsets = [2, 0, 0], sizes = [1, 8, 128], strides = [1, 1, 1]} : vector<8x8x128xf32> to vector<1x8x128xf32>
    %10 = vector.shape_cast %9 : vector<1x8x128xf32> to vector<8x128xf32>
    %11 = vector.extract_strided_slice %4 {offsets = [3, 0, 0], sizes = [1, 8, 128], strides = [1, 1, 1]} : vector<8x8x128xf32> to vector<1x8x128xf32>
    %12 = vector.shape_cast %11 : vector<1x8x128xf32> to vector<8x128xf32>
    %13 = vector.extract_strided_slice %4 {offsets = [4, 0, 0], sizes = [1, 8, 128], strides = [1, 1, 1]} : vector<8x8x128xf32> to vector<1x8x128xf32>
    %14 = vector.shape_cast %13 : vector<1x8x128xf32> to vector<8x128xf32>
    %15 = vector.extract_strided_slice %4 {offsets = [5, 0, 0], sizes = [1, 8, 128], strides = [1, 1, 1]} : vector<8x8x128xf32> to vector<1x8x128xf32>
    %16 = vector.shape_cast %15 : vector<1x8x128xf32> to vector<8x128xf32>
    %17 = vector.extract_strided_slice %4 {offsets = [6, 0, 0], sizes = [1, 8, 128], strides = [1, 1, 1]} : vector<8x8x128xf32> to vector<1x8x128xf32>
    %18 = vector.shape_cast %17 : vector<1x8x128xf32> to vector<8x128xf32>
    %19 = vector.extract_strided_slice %4 {offsets = [7, 0, 0], sizes = [1, 8, 128], strides = [1, 1, 1]} : vector<8x8x128xf32> to vector<1x8x128xf32>
    %20 = vector.shape_cast %19 : vector<1x8x128xf32> to vector<8x128xf32>
    %21 = arith.mulf %6, %6 : vector<8x128xf32>
    %22 = arith.mulf %8, %8 : vector<8x128xf32>
    %23 = arith.addf %21, %22 : vector<8x128xf32>
    %24 = arith.mulf %10, %10 : vector<8x128xf32>
    %25 = arith.addf %23, %24 : vector<8x128xf32>
    %26 = arith.mulf %12, %12 : vector<8x128xf32>
    %27 = arith.addf %25, %26 : vector<8x128xf32>
    %28 = arith.cmpf one, %27, %27 : vector<8x128xf32>
    %cst_1 = arith.constant dense<true> : vector<8x128xi1>
    %29 = arith.xori %28, %cst_1 : vector<8x128xi1>
    %30 = arith.mulf %12, %14 : vector<8x128xf32>
    %31 = arith.mulf %20, %6 : vector<8x128xf32>
    %32 = arith.subf %30, %31 : vector<8x128xf32>
    %33 = arith.mulf %18, %8 : vector<8x128xf32>
    %34 = arith.addf %32, %33 : vector<8x128xf32>
    %35 = arith.mulf %16, %10 : vector<8x128xf32>
    %36 = arith.subf %34, %35 : vector<8x128xf32>
    %37 = arith.mulf %12, %16 : vector<8x128xf32>
    %38 = arith.mulf %20, %8 : vector<8x128xf32>
    %39 = arith.subf %37, %38 : vector<8x128xf32>
    %40 = arith.mulf %14, %10 : vector<8x128xf32>
    %41 = arith.addf %39, %40 : vector<8x128xf32>
    %42 = arith.mulf %18, %6 : vector<8x128xf32>
    %43 = arith.subf %41, %42 : vector<8x128xf32>
    %44 = arith.mulf %12, %18 : vector<8x128xf32>
    %45 = arith.mulf %20, %10 : vector<8x128xf32>
    %46 = arith.subf %44, %45 : vector<8x128xf32>
    %47 = arith.mulf %16, %6 : vector<8x128xf32>
    %48 = arith.addf %46, %47 : vector<8x128xf32>
    %49 = arith.mulf %14, %8 : vector<8x128xf32>
    %50 = arith.subf %48, %49 : vector<8x128xf32>
    %51 = arith.mulf %20, %12 : vector<8x128xf32>
    %52 = arith.mulf %14, %6 : vector<8x128xf32>
    %53 = arith.addf %51, %52 : vector<8x128xf32>
    %54 = arith.mulf %16, %8 : vector<8x128xf32>
    %55 = arith.addf %53, %54 : vector<8x128xf32>
    %56 = arith.mulf %18, %10 : vector<8x128xf32>
    %57 = arith.addf %55, %56 : vector<8x128xf32>
    %cst_2 = arith.constant 0.000000e+00 : f32
    %58 = vector.broadcast %cst_2 : f32 to vector<8x128xf32>
    %59 = arith.cmpf olt, %57, %58 : vector<8x128xf32>
    %cst_3 = arith.constant -1.000000e+00 : f32
    %cst_4 = arith.constant 1.000000e+00 : f32
    %60 = vector.broadcast %cst_3 : f32 to vector<8x128xf32>
    %61 = vector.broadcast %cst_4 : f32 to vector<8x128xf32>
    %62 = arith.select %59, %60, %61 : vector<8x128xi1>, vector<8x128xf32>
    %63 = arith.mulf %36, %62 : vector<8x128xf32>
    %64 = arith.mulf %43, %62 : vector<8x128xf32>
    %65 = arith.mulf %50, %62 : vector<8x128xf32>
    %66 = arith.mulf %57, %62 : vector<8x128xf32>
    %67 = arith.mulf %63, %63 : vector<8x128xf32>
    %68 = arith.mulf %64, %64 : vector<8x128xf32>
    %69 = arith.addf %67, %68 : vector<8x128xf32>
    %70 = arith.mulf %65, %65 : vector<8x128xf32>
    %71 = arith.addf %69, %70 : vector<8x128xf32>
    %72 = arith.mulf %66, %66 : vector<8x128xf32>
    %73 = arith.addf %71, %72 : vector<8x128xf32>
    %cst_5 = arith.constant 1.000000e-30 : f32
    %74 = vector.broadcast %cst_5 : f32 to vector<8x128xf32>
    %75 = arith.maximumf %71, %74 : vector<8x128xf32>
    %76 = math.rsqrt %75 : vector<8x128xf32>
    %77 = arith.mulf %71, %76 : vector<8x128xf32>
    %78 = arith.cmpf ogt, %77, %66 : vector<8x128xf32>
    %79 = arith.select %78, %66, %77 : vector<8x128xi1>, vector<8x128xf32>
    %80 = arith.select %78, %77, %66 : vector<8x128xi1>, vector<8x128xf32>
    %cst_6 = arith.constant 1.000000e-30 : f32
    %81 = vector.broadcast %cst_6 : f32 to vector<8x128xf32>
    %82 = arith.maximumf %80, %81 : vector<8x128xf32>
    %83 = tpu.reciprocal %82 {approx = true} : vector<8x128xf32> -> vector<8x128xf32>
    %84 = arith.mulf %82, %83 : vector<8x128xf32>
    %cst_7 = arith.constant 2.000000e+00 : f32
    %85 = vector.broadcast %cst_7 : f32 to vector<8x128xf32>
    %86 = arith.subf %85, %84 : vector<8x128xf32>
    %87 = arith.mulf %83, %86 : vector<8x128xf32>
    %88 = arith.mulf %79, %87 : vector<8x128xf32>
    %89 = arith.mulf %88, %88 : vector<8x128xf32>
    %cst_8 = arith.constant -1.172120e-02 : f32
    %90 = vector.broadcast %cst_8 : f32 to vector<8x128xf32>
    %91 = arith.mulf %90, %89 : vector<8x128xf32>
    %cst_9 = arith.constant 0.0526533201 : f32
    %92 = vector.broadcast %cst_9 : f32 to vector<8x128xf32>
    %93 = arith.addf %91, %92 : vector<8x128xf32>
    %94 = arith.mulf %93, %89 : vector<8x128xf32>
    %cst_10 = arith.constant -0.116432868 : f32
    %95 = vector.broadcast %cst_10 : f32 to vector<8x128xf32>
    %96 = arith.addf %94, %95 : vector<8x128xf32>
    %97 = arith.mulf %96, %89 : vector<8x128xf32>
    %cst_11 = arith.constant 0.193543464 : f32
    %98 = vector.broadcast %cst_11 : f32 to vector<8x128xf32>
    %99 = arith.addf %97, %98 : vector<8x128xf32>
    %100 = arith.mulf %99, %89 : vector<8x128xf32>
    %cst_12 = arith.constant -0.332623482 : f32
    %101 = vector.broadcast %cst_12 : f32 to vector<8x128xf32>
    %102 = arith.addf %100, %101 : vector<8x128xf32>
    %103 = arith.mulf %102, %89 : vector<8x128xf32>
    %cst_13 = arith.constant 0.999977231 : f32
    %104 = vector.broadcast %cst_13 : f32 to vector<8x128xf32>
    %105 = arith.addf %103, %104 : vector<8x128xf32>
    %106 = arith.mulf %105, %88 : vector<8x128xf32>
    %cst_14 = arith.constant 1.57079637 : f32
    %107 = vector.broadcast %cst_14 : f32 to vector<8x128xf32>
    %108 = arith.subf %107, %106 : vector<8x128xf32>
    %109 = arith.select %78, %108, %106 : vector<8x128xi1>, vector<8x128xf32>
    %cst_15 = arith.constant 2.000000e+00 : f32
    %110 = vector.broadcast %cst_15 : f32 to vector<8x128xf32>
    %111 = arith.mulf %110, %109 : vector<8x128xf32>
    %112 = arith.mulf %111, %111 : vector<8x128xf32>
    %cst_16 = arith.constant 1.000000e-30 : f32
    %113 = vector.broadcast %cst_16 : f32 to vector<8x128xf32>
    %114 = arith.maximumf %73, %113 : vector<8x128xf32>
    %115 = math.rsqrt %114 : vector<8x128xf32>
    %cst_17 = arith.constant 0.0833333358 : f32
    %116 = vector.broadcast %cst_17 : f32 to vector<8x128xf32>
    %117 = arith.mulf %112, %116 : vector<8x128xf32>
    %cst_18 = arith.constant 2.000000e+00 : f32
    %118 = vector.broadcast %cst_18 : f32 to vector<8x128xf32>
    %119 = arith.addf %118, %117 : vector<8x128xf32>
    %120 = arith.mulf %112, %112 : vector<8x128xf32>
    %cst_19 = arith.constant 0.00243055564 : f32
    %121 = vector.broadcast %cst_19 : f32 to vector<8x128xf32>
    %122 = arith.mulf %120, %121 : vector<8x128xf32>
    %123 = arith.addf %119, %122 : vector<8x128xf32>
    %124 = arith.mulf %115, %123 : vector<8x128xf32>
    %125 = arith.mulf %111, %76 : vector<8x128xf32>
    %cst_20 = arith.constant 1.000000e-03 : f32
    %126 = vector.broadcast %cst_20 : f32 to vector<8x128xf32>
    %127 = arith.cmpf ole, %111, %126 : vector<8x128xf32>
    %128 = arith.select %127, %124, %125 : vector<8x128xi1>, vector<8x128xf32>
    %129 = arith.mulf %128, %63 : vector<8x128xf32>
    %130 = math.absf %129 : vector<8x128xf32>
    %cst_21 = arith.constant 1.000000e+00 : f32
    %131 = vector.broadcast %cst_21 : f32 to vector<8x128xf32>
    %132 = arith.minimumf %130, %131 : vector<8x128xf32>
    %cst_22 = arith.constant 5.000000e-01 : f32
    %133 = vector.broadcast %cst_22 : f32 to vector<8x128xf32>
    %134 = arith.mulf %133, %132 : vector<8x128xf32>
    %135 = arith.subf %130, %134 : vector<8x128xf32>
    %136 = arith.mulf %132, %135 : vector<8x128xf32>
    %137 = arith.mulf %128, %64 : vector<8x128xf32>
    %138 = math.absf %137 : vector<8x128xf32>
    %cst_23 = arith.constant 1.000000e+00 : f32
    %139 = vector.broadcast %cst_23 : f32 to vector<8x128xf32>
    %140 = arith.minimumf %138, %139 : vector<8x128xf32>
    %cst_24 = arith.constant 5.000000e-01 : f32
    %141 = vector.broadcast %cst_24 : f32 to vector<8x128xf32>
    %142 = arith.mulf %141, %140 : vector<8x128xf32>
    %143 = arith.subf %138, %142 : vector<8x128xf32>
    %144 = arith.mulf %140, %143 : vector<8x128xf32>
    %145 = arith.addf %136, %144 : vector<8x128xf32>
    %146 = arith.mulf %128, %65 : vector<8x128xf32>
    %147 = math.absf %146 : vector<8x128xf32>
    %cst_25 = arith.constant 1.000000e+00 : f32
    %148 = vector.broadcast %cst_25 : f32 to vector<8x128xf32>
    %149 = arith.minimumf %147, %148 : vector<8x128xf32>
    %cst_26 = arith.constant 5.000000e-01 : f32
    %150 = vector.broadcast %cst_26 : f32 to vector<8x128xf32>
    %151 = arith.mulf %150, %149 : vector<8x128xf32>
    %152 = arith.subf %147, %151 : vector<8x128xf32>
    %153 = arith.mulf %149, %152 : vector<8x128xf32>
    %154 = arith.addf %145, %153 : vector<8x128xf32>
    %cst_27 = arith.constant 0.333333343 : f32
    %155 = vector.broadcast %cst_27 : f32 to vector<8x128xf32>
    %156 = arith.mulf %154, %155 : vector<8x128xf32>
    %cst_28 = arith.constant 0.000000e+00 : f32
    %157 = vector.broadcast %cst_28 : f32 to vector<8x128xf32>
    %158 = arith.select %29, %156, %157 : vector<8x128xi1>, vector<8x128xf32>
    %159 = arith.addf %0, %158 : vector<8x128xf32>
    %160 = arith.extui %29 : vector<8x128xi1> to vector<8x128xi32>
    %161 = arith.sitofp %160 : vector<8x128xi32> to vector<8x128xf32>
    %162 = arith.addf %0, %161 : vector<8x128xf32>
    %c1_i32 = arith.constant 1 : i32
    %c0_29 = arith.constant 0 : index
    %c0_30 = arith.constant 0 : index
    %c0_31 = arith.constant 0 : index
    %163 = vector.load %arg2[%c0_29, %c0_30, %c0_31] : memref<1x8x128xf32, #tpu.memory_space<vmem>>, vector<1x8x128xf32>
    %164 = vector.shape_cast %163 : vector<1x8x128xf32> to vector<8x128xf32>
    %165 = vector.shape_cast %159 : vector<8x128xf32> to vector<1x8x128xf32>
    tpu.vector_store %arg2[%c0_29, %c0_30, %c0_31], %165 {strides = array<i32>} : memref<1x8x128xf32, #tpu.memory_space<vmem>>, vector<1x8x128xf32>,
    %c0_32 = arith.constant 0 : index
    %c0_33 = arith.constant 0 : index
    %c0_34 = arith.constant 0 : index
    %166 = vector.load %arg3[%c0_32, %c0_33, %c0_34] : memref<1x8x128xf32, #tpu.memory_space<vmem>>, vector<1x8x128xf32>
    %167 = vector.shape_cast %166 : vector<1x8x128xf32> to vector<8x128xf32>
    %168 = vector.shape_cast %162 : vector<8x128xf32> to vector<1x8x128xf32>
    tpu.vector_store %arg3[%c0_32, %c0_33, %c0_34], %168 {strides = array<i32>} : memref<1x8x128xf32, #tpu.memory_space<vmem>>, vector<1x8x128xf32>,
    return
  }
  func.func @transform_0(%arg0: i32) -> (i32, i32, i32) {
    %c0_i32 = arith.constant 0 : i32
    %c0_i32_0 = arith.constant 0 : i32
    %c0_i32_1 = arith.constant 0 : i32
    return %c0_i32, %arg0, %c0_i32_0 : i32, i32, i32
  }
  func.func @transform_1(%arg0: i32) -> (i32, i32, i32) {
    %c0_i32 = arith.constant 0 : i32
    %c0_i32_0 = arith.constant 0 : i32
    %c0_i32_1 = arith.constant 0 : i32
    return %arg0, %c0_i32, %c0_i32_0 : i32, i32, i32
  }
  func.func @transform_2(%arg0: i32) -> (i32, i32, i32) {
    %c0_i32 = arith.constant 0 : i32
    %c0_i32_0 = arith.constant 0 : i32
    %c0_i32_1 = arith.constant 0 : i32
    return %arg0, %c0_i32, %c0_i32_0 : i32, i32, i32
  }
}

</mosaic_0001>

<bundles_post_ra>
// kernel: _quaternion_loss_pallas.1
= control target key start
LH: loop header
LB: loop body
LE: loop exit
PB: predicated region body
PF: predicated region fallthrough
CT: control target
= control target key end

     0   :  { %v171_v43 = vmov 1.0   ;;  %vm172_vm6 = vmmov 1   ;;  %s249_s0 = inlined_call_operand.vmem [shape: f32[8,8,128], index: 0, kind: input, shape index: {}]   ;;  %s250_s2 = inlined_call_operand.vmem [shape: f32[1,8,128], index: 2, kind: output, shape index: {1}]   ;;  %s251_s1 = inlined_call_operand.vmem [shape: f32[1,8,128], index: 1, kind: output, shape index: {0}]  }
   0x1   :  { %v10_v0 = vld [vmem:[%s249_s0] sm:$0xff]  ;;  %v11_v1 = vld [vmem:[%s249_s0 + $0x8] sm:$0xff]  ;;  %v12_v2 = vld [vmem:[%s249_s0 + $0x10] sm:$0xff] }
   0x2   :  { %v13_v3 = vld [vmem:[%s249_s0 + $0x18] sm:$0xff]  ;;  %v14_v4 = vld [vmem:[%s249_s0 + $0x20] sm:$0xff]  ;;  %v15_v5 = vld [vmem:[%s249_s0 + $0x28] sm:$0xff]  ;;  %v18_v6 = vmul.f32 %v10_v0, %v10_v0  ;;  %v19_v7 = vmul.f32 %v11_v1, %v11_v1  ;;  %v21_v8 = vmul.f32 %v12_v2, %v12_v2 }
   0x3   :  { %v16_v9 = vld [vmem:[%s249_s0 + $0x30] sm:$0xff]  ;;  %v17_v10 = vld [vmem:[%s249_s0 + $0x38] sm:$0xff]  ;;  %v23_v11 = vmul.f32 %v13_v3, %v13_v3  ;;  %v27_v12 = vmul.f32 %v14_v4, %v13_v3  ;;  %v34_v13 = vmul.f32 %v15_v5, %v13_v3  ;;  %v32_v18 = vmul.f32 %v15_v5, %v12_v2 }
   0x4   :  { %v20_v14 = vadd.f32 %v19_v7, %v18_v6  ;;  %v28_v15 = vmul.f32 %v17_v10, %v10_v0  ;;  %v30_v16 = vmul.f32 %v16_v9, %v11_v1  ;;  %v35_v17 = vmul.f32 %v17_v10, %v11_v1 }
   0x5   :  { %v37_v19 = vmul.f32 %v14_v4, %v12_v2  ;;  %v41_v20 = vmul.f32 %v16_v9, %v13_v3  ;;  %v42_v21 = vmul.f32 %v17_v10, %v12_v2  ;;  %v44_v25 = vmul.f32 %v15_v5, %v10_v0 }
   0x6   :  { %v22_v22 = vadd.f32 %v21_v8, %v20_v14  ;;  %v29_v23 = vsub.f32 %v27_v12, %v28_v15  ;;  %v36_v24 = vsub.f32 %v34_v13, %v35_v17  ;;  %v39_v26 = vmul.f32 %v16_v9, %v10_v0 }
   0x7   :  { %v43_v27 = vsub.f32 %v41_v20, %v42_v21  ;;  %v48_v28 = vmul.f32 %v17_v10, %v13_v3  ;;  %v49_v29 = vmul.f32 %v14_v4, %v10_v0  ;;  %v46_v32 = vmul.f32 %v14_v4, %v11_v1 }
   0x8   :  { %v213_v30 = vadd.f32 %v23_v11, %v22_v22  ;;  %v31_v31 = vadd.f32 %v30_v16, %v29_v23  ;;  %v51_v33 = vmul.f32 %v15_v5, %v11_v1  ;;  %v38_v34 = vadd.f32 %v37_v19, %v36_v24 }
   0x9   :  { %v45_v35 = vadd.f32 %v44_v25, %v43_v27  ;;  %v50_v36 = vadd.f32 %v49_v29, %v48_v28  ;;  %v53_v37 = vmul.f32 %v16_v9, %v12_v2 }
   0xa   :  { %v33_v39 = vsub.f32 %v31_v31, %v32_v18  ;;  %v40_v40 = vsub.f32 %v38_v34, %v39_v26  ;;  %vm25_vm5 = vcmp.ne.f32.partialorder %v213_v30, %v213_v30  ;;  %v173_v31 = vmov 0.0  }
   0xb   :  { %v52_v38 = vadd.f32 %v51_v33, %v50_v36  ;;  %v47_v41 = vsub.f32 %v45_v35, %v46_v32  ;;  %vm231_vm7 = vmxor %vm25_vm5, %vm172_vm6 }
   0xc   :  { %v161_v32 = vsel %vm231_vm7, 1.0, %v173_v31 }
   0xd   :  { %v54_v42 = vadd.f32 %v53_v37, %v52_v38  ;;  %152 = vst [vmem:[%s250_s2] sm:$0xff] %v161_v32 }
   0xf   :  { %vm55_vm0 = vcmp.lt.f32.partialorder %v54_v42, 0.0 }
  0x10   :  { %v56_v44 = vsel %vm55_vm0, -1.0, %v171_v43 }
  0x11   :  { %v215_v45 = vmul.f32 %v56_v44, %v33_v39  ;;  %v217_v46 = vmul.f32 %v56_v44, %v40_v40  ;;  %v219_v47 = vmul.f32 %v56_v44, %v47_v41  ;;  %v60_v60 = vmul.f32 %v56_v44, %v54_v42 }
  0x13   :  { %v61_v48 = vmul.f32 %v215_v45, %v215_v45  ;;  %v62_v49 = vmul.f32 %v217_v46, %v217_v46  ;;  %v64_v50 = vmul.f32 %v219_v47, %v219_v47  ;;  %v66_v3 = vmul.f32 %v60_v60, %v60_v60 }
  0x15   :  { %v63_v51 = vadd.f32 %v62_v49, %v61_v48 }
  0x17   :  { %v65_v52 = vadd.f32 %v64_v50, %v63_v51 }
  0x19   :  { %v68_v53 = vmax.f32 %v65_v52, 1e-30  ;;  %v67_v7 = vadd.f32 %v66_v3, %v65_v52 }
  0x1b   :  { %165 = vrsqrt.f32 %v68_v53  ;;  %vm75_vm1 = vweird.f32 %v68_v53  ;;  %v105_v10 = vmax.f32 %v67_v7, 1e-30 }
  0x1d   :  { %vm112_vm8 = vweird.f32 %v105_v10 }
  0x21   :  { %v166_v54 = vpop.eup %165 }
  0x22   :  { %v70_v55 = vmul.f32 %v166_v54, %v68_v53  ;;  %vm76_vm2 = vweird.f32 %v166_v54 }
  0x23   :  { %vm77_vm3 = vmor %vm75_vm1, %vm76_vm2 }
  0x24   :  { %v71_v56 = vmul.f32 %v166_v54, %v70_v55 }
  0x26   :  { %v72_v57 = vmul.f32 0.5, %v71_v56 }
  0x28   :  { %v73_v58 = vsub.f32 1.5, %v72_v57 }
  0x2a   :  { %v74_v59 = vmul.f32 %v166_v54, %v73_v58 }
  0x2c   :  { %v78_v61 = vsel %vm77_vm3, %v166_v54, %v74_v59 }
  0x2d   :  { %v79_v62 = vmul.f32 %v78_v61, %v65_v52 }
  0x2f   :  { %vm80_vm4 = vcmp.gt.f32.partialorder %v79_v62, %v60_v60 }
  0x30   :  { %v82_v63 = vsel %vm80_vm4, %v79_v62, %v60_v60  ;;  %v81_v5 = vsel %vm80_vm4, %v60_v60, %v79_v62 }
  0x31   :  { %v83_v0 = vmax.f32 %v82_v63, 1e-30 }
  0x33   :  { %167 = vrcp.f32 %v83_v0 }
  0x34   :  { %169 = vrsqrt.f32 %v105_v10 }
  0x39   :  { %v168_v1 = vpop.eup %167 }
  0x3a   :  { %v85_v2 = vmul.f32 %v168_v1, %v83_v0  ;;  %v170_v16 = vpop.eup %169 }
  0x3b   :  { %v107_v19 = vmul.f32 %v170_v16, %v105_v10  ;;  %vm113_vm9 = vweird.f32 %v170_v16 }
  0x3c   :  { %v86_v4 = vsub.f32 2.0, %v85_v2  ;;  %vm114_vm10 = vmor %vm112_vm8, %vm113_vm9 }
  0x3d   :  { %v108_v22 = vmul.f32 %v170_v16, %v107_v19 }
  0x3e   :  { %v87_v6 = vmul.f32 %v168_v1, %v86_v4 }
  0x3f   :  { %v109_v25 = vmul.f32 0.5, %v108_v22 }
  0x40   :  { %v88_v8 = vmul.f32 %v87_v6, %v81_v5 }
  0x41   :  { %v110_v29 = vsub.f32 1.5, %v109_v25 }
  0x42   :  { %v89_v9 = vmul.f32 %v88_v8, %v88_v8 }
  0x43   :  { %v111_v34 = vmul.f32 %v170_v16, %v110_v29 }
  0x44   :  { %v90_v11 = vmul.f32 -0.0117212, %v89_v9 }
  0x45   :  { %v115_v39 = vsel %vm114_vm10, %v170_v16, %v111_v34 }
  0x46   :  { %v91_v12 = vadd.f32 0.05265332, %v90_v11 }
  0x48   :  { %v92_v13 = vmul.f32 %v91_v12, %v89_v9 }
  0x4a   :  { %v93_v14 = vadd.f32 -0.11643287, %v92_v13 }
  0x4c   :  { %v94_v15 = vmul.f32 %v93_v14, %v89_v9 }
  0x4e   :  { %v95_v17 = vadd.f32 0.19354346, %v94_v15 }
  0x50   :  { %v96_v18 = vmul.f32 %v95_v17, %v89_v9 }
  0x52   :  { %v97_v20 = vadd.f32 -0.33262348, %v96_v18 }
  0x54   :  { %v98_v21 = vmul.f32 %v97_v20, %v89_v9 }
  0x56   :  { %v99_v23 = vadd.f32 0.99997723, %v98_v21 }
  0x58   :  { %v100_v24 = vmul.f32 %v99_v23, %v88_v8 }
  0x5a   :  { %v101_v27 = vsub.f32 1.5707964, %v100_v24 }
  0x5c   :  { %v102_v28 = vsel %vm80_vm4, %v101_v27, %v100_v24 }
  0x5d   :  { %v103_v33 = vmul.f32 2.0, %v102_v28 }
  0x5f   :  { %v104_v30 = vmul.f32 %v103_v33, %v103_v33  ;;  %v122_v41 = vmul.f32 %v103_v33, %v78_v61  ;;  %vm123_vm11 = vcmp.le.f32.partialorder %v103_v33, 0.001 }
  0x61   :  { %v116_v35 = vmul.f32 0.083333336, %v104_v30  ;;  %v118_v36 = vmul.f32 %v104_v30, %v104_v30 }
  0x63   :  { %v117_v37 = vadd.f32 2.0, %v116_v35  ;;  %v119_v38 = vmul.f32 0.0024305556, %v118_v36 }
  0x65   :  { %v120_v40 = vadd.f32 %v119_v38, %v117_v37 }
  0x67   :  { %v121_v42 = vmul.f32 %v120_v40, %v115_v39 }
  0x69   :  { %v124_v43 = vsel %vm123_vm11, %v121_v42, %v122_v41 }
  0x6a   :  { %v125_v44 = vmul.f32 %v124_v43, %v215_v45  ;;  %v131_v48 = vmul.f32 %v124_v43, %v217_v46  ;;  %v138_v49 = vmul.f32 %v124_v43, %v219_v47 }
  0x6c   :  { %v126_v50 = vand.u32 2147483647, %v125_v44  ;;  %v132_v51 = vand.u32 2147483647, %v131_v48  ;;  %v139_v52 = vand.u32 2147483647, %v138_v49 }
  0x6e   :  { %v127_v53 = vmin.f32 %v126_v50, 1.0  ;;  %v133_v54 = vmin.f32 %v132_v51, 1.0  ;;  %v140_v55 = vmin.f32 %v139_v52, 1.0 }
  0x70   :  { %v128_v56 = vmul.f32 0.5, %v127_v53  ;;  %v134_v57 = vmul.f32 0.5, %v133_v54  ;;  %v141_v58 = vmul.f32 0.5, %v140_v55 }
  0x72   :  { %v129_v59 = vsub.f32 %v126_v50, %v128_v56  ;;  %v135_v60 = vsub.f32 %v132_v51, %v134_v57  ;;  %v142_v61 = vsub.f32 %v139_v52, %v141_v58 }
  0x74   :  { %v130_v62 = vmul.f32 %v129_v59, %v127_v53  ;;  %v136_v63 = vmul.f32 %v135_v60, %v133_v54  ;;  %v143_v0 = vmul.f32 %v142_v61, %v140_v55 }
  0x76   :  { %v137_v45 = vadd.f32 %v136_v63, %v130_v62 }
  0x78   :  { %v144_v1 = vadd.f32 %v143_v0, %v137_v45 }
  0x7a   :  { %v145_v46 = vmul.f32 0.33333334, %v144_v1 }
  0x7c   :  { %v146_v47 = vsel %vm231_vm7, %v145_v46, 0.0 }
  0x7d   :  { %151 = vst [vmem:[%s251_s1] sm:$0xff] %v146_v47 }

</bundles_post_ra>
